<compile_context>
chip_gen: v6e
topology: v6e:2x2x1
jax: 0.10.0
libtpu: 0.0.40
codegen_flags: <defaults>
</compile_context>

<pallas_src>
import functools

import jax
import jax.numpy as jnp
from jax.experimental import pallas as pl
from jax.experimental.pallas import tpu as pltpu


# ----------------------------- Pallas kernel -------------------------------

def _transition_kernel(*refs, num_layers, num_inputs, eps, neg_slope, use_bf16_matmul):
    """refs = (input refs..., per-layer param refs..., out_ref).

    Layer 0 takes `num_inputs` weight chunks (one per input, accumulated) -> no HBM concat.
    Hidden layers (i < num_layers): w, b, gamma, beta -> Linear + LayerNorm + LeakyReLU.
    Last layer: w, b -> Linear (identity norm / act).
    """
    in_refs = refs[:num_inputs]
    out_ref = refs[-1]
    p = refs[num_inputs:-1]

    def mm(h, w_ref):
        if use_bf16_matmul:
            # Weights are already bf16-resident (cast once in the wrapper); only the
            # activation needs a cast here. Accumulate in f32 on the MXU.
            h = h.astype(jnp.bfloat16)
        return jnp.dot(h, w_ref[...], preferred_element_type=jnp.float32)

    idx = 0
    h = None
    for layer_i in range(num_layers + 1):
        if layer_i == 0:
            acc = mm(in_refs[0][...].astype(jnp.float32), p[idx]); idx += 1
            for j in range(1, num_inputs):
                acc = acc + mm(in_refs[j][...].astype(jnp.float32), p[idx]); idx += 1
        else:
            acc = mm(h, p[idx]); idx += 1
        acc = acc + p[idx][...]; idx += 1                      # bias
        if layer_i < num_layers:
            g = p[idx][...]; beta = p[idx + 1][...]; idx += 2
            # LayerNorm over the feature (lane) axis; two-pass variance (no cancellation),
            # biased variance + eps=1e-5 matches torch defaults.
            mean = jnp.mean(acc, axis=-1, keepdims=True)
            c = acc - mean
            var = jnp.mean(c * c, axis=-1, keepdims=True)
            acc = c * jax.lax.rsqrt(var + eps)
            acc = acc * g + beta
            # LeakyReLU (slope in (0,1)) as a single max -> saves a cmp/select on the VPU.
            h = jnp.maximum(acc, neg_slope * acc)
        else:
            out_ref[...] = acc.astype(out_ref.dtype)


# ----------------------------- kernel wrapper -------------------------------

def _round_up(x, m):
    return ((x + m - 1) // m) * m


def transition_rgn_forward(z_t_1, params, z_c=None, *, row_tile=None,
                           use_bf16_matmul=False):
    """Fused Transition_RGN forward. z_t_1: [B, latent_dim] (+ z_c: [B, latent_dim] if domain)."""
    domain = params["domain"]
    num_layers = params["num_layers"]
    latent_dim = params["latent_dim"]

    inputs = [z_t_1.astype(jnp.float32)]
    if domain:
        assert z_c is not None
        inputs.append(z_c.astype(jnp.float32))
    B = inputs[0].shape[0]
    in_dims = [int(x.shape[1]) for x in inputs]

    # Row tiling: multiple of 8 (sublane). For mid/large batches force >= 2 grid steps so the
    # v7x megacore can shard row tiles across both TensorCores. Ragged last block is masked.
    if row_tile is None:
        row_tile = min(512, _round_up(B, 8))
        if B >= 256:
            row_tile = min(row_tile, _round_up(pl.cdiv(B, 2), 8))
    row_tile = max(8, _round_up(row_tile, 8))
    grid = (pl.cdiv(B, row_tile),)

    # Flatten parameters, feature-last layout. Weights optionally bf16-resident (cast ONCE
    # here, not per grid step in the kernel). First-layer weight split per input (domain).
    wdtype = jnp.bfloat16 if use_bf16_matmul else jnp.float32
    flat_params = []
    for li, layer in enumerate(params["layers"]):
        w = layer["w"].astype(wdtype)
        if li == 0 and len(inputs) > 1:
            off = 0
            for d in in_dims:
                flat_params.append(w[off:off + d, :])
                off += d
        else:
            flat_params.append(w)
        flat_params.append(layer["b"].astype(jnp.float32))
        if "g" in layer:  # hidden layers carry a LayerNorm; last layer is Identity
            flat_params.append(layer["g"].astype(jnp.float32))
            flat_params.append(layer["beta"].astype(jnp.float32))

    # Explicit scoped-VMEM budget: resident params (x2 headroom) + double-buffered I/O row
    # tiles + a few live activation slabs. Clamped to [32 MiB, 64 MiB] for portability.
    param_bytes = sum(int(a.size) * a.dtype.itemsize for a in flat_params)
    max_dim = max(in_dims + [latent_dim] + [int(l["w"].shape[1]) for l in params["layers"]])
    io_bytes = 2 * row_tile * (sum(in_dims) + latent_dim) * 4
    act_bytes = 8 * row_tile * max_dim * 4
    vmem_limit = int(min(64 << 20, max(32 << 20, 2 * param_bytes + io_bytes + act_bytes + (4 << 20))))

    kernel = functools.partial(
        _transition_kernel,
        num_layers=num_layers,
        num_inputs=len(inputs),
        eps=1e-5,          # torch nn.LayerNorm default
        neg_slope=0.01,    # torch nn.LeakyReLU default
        use_bf16_matmul=use_bf16_matmul,
    )

    def make_param_spec(shape, pipeline_mode):
        if pipeline_mode is None:
            return pl.BlockSpec(shape, lambda i: (0, 0))
        return pl.BlockSpec(shape, lambda i: (0, 0), pipeline_mode=pipeline_mode)

    def run(param_pipeline_mode):
        in_specs = [pl.BlockSpec((row_tile, d), lambda i: (i, 0)) for d in in_dims]
        in_specs += [make_param_spec(a.shape, param_pipeline_mode) for a in flat_params]
        return pl.pallas_call(
            kernel,
            out_shape=jax.ShapeDtypeStruct((B, latent_dim), jnp.float32),
            grid=grid,
            in_specs=in_specs,
            out_specs=pl.BlockSpec((row_tile, latent_dim), lambda i: (i, 0)),
            compiler_params=pltpu.CompilerParams(
                dimension_semantics=("parallel",),   # rows independent -> megacore on v7x
                vmem_limit_bytes=vmem_limit,
            ),
        )(*inputs, *flat_params)

    try:
        # Constant-index params: request single buffering (their block index never changes,
        # so the default second buffer is a dead copy of every weight in VMEM).
        return run(pl.Buffered(1))
    except Exception:
        # Fallback: default (double) buffering if single-buffering is rejected by this build.
        return run(None)


# ------------------------------ parameters ----------------------------------

def init_params(key, latent_dim, transition_dim, num_layers, domain=False):
    """Replicates nn.Linear default init (U(-1/sqrt(fan_in), +)) and fresh nn.LayerNorm."""
    in0 = latent_dim * 2 if domain else latent_dim
    dims = [in0] + num_layers * [transition_dim] + [latent_dim]
    keys = jax.random.split(key, len(dims) - 1)
    layers = []
    for i, (n_in, n_out) in enumerate(zip(dims[:-1], dims[1:])):
        kw, kb = jax.random.split(keys[i])
        bound = 1.0 / float(n_in) ** 0.5
        w = jax.random.uniform(kw, (n_in, n_out), jnp.float32, -bound, bound)
        b = jax.random.uniform(kb, (1, n_out), jnp.float32, -bound, bound)
        layer = dict(w=w, b=b)
        if i < num_layers:  # hidden layers carry a LayerNorm; last layer is Identity
            layer["g"] = jnp.ones((1, n_out), jnp.float32)
            layer["beta"] = jnp.zeros((1, n_out), jnp.float32)
        layers.append(layer)
    return dict(layers=layers, num_layers=num_layers, latent_dim=latent_dim, domain=domain)


# --------------------------- pure-JAX reference ------------------------------

def transition_rgn_reference(z_t_1, params, z_c=None):
    z = jnp.concatenate([z_t_1, z_c], axis=1) if params["domain"] else z_t_1
    for i, layer in enumerate(params["layers"]):
        z = z @ layer["w"] + layer["b"]
        if i < params["num_layers"]:
            mean = jnp.mean(z, axis=-1, keepdims=True)
            var = jnp.mean(jnp.square(z - mean), axis=-1, keepdims=True)
            z = (z - mean) / jnp.sqrt(var + 1e-5)
            z = z * layer["g"] + layer["beta"]
            z = jnp.where(z >= 0.0, z, 0.01 * z)
    return z


# --------------------------------- driver ------------------------------------

if __name__ == "__main__":
    B, latent_dim, transition_dim, num_layers = 4, 64, 128, 2

    key = jax.random.PRNGKey(0)
    kz, kc, kp, kp2 = jax.random.split(key, 4)
    z_t_1 = jax.random.normal(kz, (B, latent_dim), jnp.float32)

    # domain=False
    params = init_params(kp, latent_dim, transition_dim, num_layers, domain=False)
    out = transition_rgn_forward(z_t_1, params)
    jax.block_until_ready(out)
    ref = transition_rgn_reference(z_t_1, params)
    assert out.shape == (B, latent_dim)
    assert bool(jnp.all(jnp.isfinite(out)))
    assert bool(jnp.allclose(out, ref, atol=1e-4, rtol=1e-4))

    # domain=True: z_c is a separate kernel input; first-layer matmul is split (no HBM concat).
    z_c = jax.random.normal(kc, (B, latent_dim), jnp.float32)
    params_d = init_params(kp2, latent_dim, transition_dim, num_layers, domain=True)
    out_d = transition_rgn_forward(z_t_1, params_d, z_c)
    jax.block_until_ready(out_d)
    ref_d = transition_rgn_reference(z_t_1, params_d, z_c)
    assert out_d.shape == (B, latent_dim)
    assert bool(jnp.all(jnp.isfinite(out_d)))
    assert bool(jnp.allclose(out_d, ref_d, atol=1e-4, rtol=1e-4))

    print("KERNEL_OK")
</pallas_src>

<mosaic_0001>
module attributes {stable_mosaic.version = 11 : i64} {
  func.func @_transition_kernel(%arg0: i32, %arg1: memref<8x64xf32, #tpu.memory_space<vmem>>, %arg2: memref<64x128xf32, #tpu.memory_space<vmem>>, %arg3: memref<1x128xf32, #tpu.memory_space<vmem>>, %arg4: memref<1x128xf32, #tpu.memory_space<vmem>>, %arg5: memref<1x128xf32, #tpu.memory_space<vmem>>, %arg6: memref<128x128xf32, #tpu.memory_space<vmem>>, %arg7: memref<1x128xf32, #tpu.memory_space<vmem>>, %arg8: memref<1x128xf32, #tpu.memory_space<vmem>>, %arg9: memref<1x128xf32, #tpu.memory_space<vmem>>, %arg10: memref<128x64xf32, #tpu.memory_space<vmem>>, %arg11: memref<1x64xf32, #tpu.memory_space<vmem>>, %arg12: memref<8x64xf32, #tpu.memory_space<vmem>>) attributes {dimension_semantics = [#tpu.dimension_semantics<parallel>], iteration_bounds = array<i64: 1>, scalar_prefetch = 0 : i64, scratch_operands = 0 : i64, tpu.core_type = #tpu.core_type<tc>, window_params = [{transform_indices = @transform_0, window_bounds = array<i64: 8, 64>}, {pipeline_mode = #tpu.pipeline_mode<synchronous>, transform_indices = @transform_1, window_bounds = array<i64: 64, 128>}, {pipeline_mode = #tpu.pipeline_mode<synchronous>, transform_indices = @transform_2, window_bounds = array<i64: 1, 128>}, {pipeline_mode = #tpu.pipeline_mode<synchronous>, transform_indices = @transform_3, window_bounds = array<i64: 1, 128>}, {pipeline_mode = #tpu.pipeline_mode<synchronous>, transform_indices = @transform_4, window_bounds = array<i64: 1, 128>}, {pipeline_mode = #tpu.pipeline_mode<synchronous>, transform_indices = @transform_5, window_bounds = array<i64: 128, 128>}, {pipeline_mode = #tpu.pipeline_mode<synchronous>, transform_indices = @transform_6, window_bounds = array<i64: 1, 128>}, {pipeline_mode = #tpu.pipeline_mode<synchronous>, transform_indices = @transform_7, window_bounds = array<i64: 1, 128>}, {pipeline_mode = #tpu.pipeline_mode<synchronous>, transform_indices = @transform_8, window_bounds = array<i64: 1, 128>}, {pipeline_mode = #tpu.pipeline_mode<synchronous>, transform_indices = @transform_9, window_bounds = array<i64: 128, 64>}, {pipeline_mode = #tpu.pipeline_mode<synchronous>, transform_indices = @transform_10, window_bounds = array<i64: 1, 64>}, {transform_indices = @transform_11, window_bounds = array<i64: 8, 64>}]} {
    %c0 = arith.constant 0 : index
    %c0_0 = arith.constant 0 : index
    %0 = vector.load %arg1[%c0, %c0_0] : memref<8x64xf32, #tpu.memory_space<vmem>>, vector<8x64xf32>
    %c0_1 = arith.constant 0 : index
    %c0_2 = arith.constant 0 : index
    %1 = vector.load %arg2[%c0_1, %c0_2] : memref<64x128xf32, #tpu.memory_space<vmem>>, vector<64x128xf32>
    %cst = arith.constant dense<0.000000e+00> : vector<8x128xf32>
    %2 = tpu.matmul %0, %1, %cst {dimension_numbers = #tpu.dot_dimension_numbers<[1], [0], [0], [1], [0, 0, 1, 1], [], []>} : vector<8x64xf32>, vector<64x128xf32>, vector<8x128xf32> -> vector<8x128xf32>
    %c0_3 = arith.constant 0 : index
    %c0_4 = arith.constant 0 : index
    %3 = vector.load %arg3[%c0_3, %c0_4] : memref<1x128xf32, #tpu.memory_space<vmem>>, vector<1x128xf32>
    %4 = vector.broadcast %3 : vector<1x128xf32> to vector<8x128xf32>
    %5 = arith.addf %2, %4 : vector<8x128xf32>
    %c0_5 = arith.constant 0 : index
    %c0_6 = arith.constant 0 : index
    %6 = vector.load %arg4[%c0_5, %c0_6] : memref<1x128xf32, #tpu.memory_space<vmem>>, vector<1x128xf32>
    %c0_7 = arith.constant 0 : index
    %c0_8 = arith.constant 0 : index
    %7 = vector.load %arg5[%c0_7, %c0_8] : memref<1x128xf32, #tpu.memory_space<vmem>>, vector<1x128xf32>
    %cst_9 = arith.constant dense<0.000000e+00> : vector<8xf32>
    %8 = vector.multi_reduction <add>, %5, %cst_9 [1] : vector<8x128xf32> to vector<8xf32>
    %9 = vector.shape_cast %8 : vector<8xf32> to vector<8x1xf32>
    %cst_10 = arith.constant 1.280000e+02 : f32
    %10 = vector.broadcast %cst_10 : f32 to vector<8x1xf32>
    %11 = arith.divf %9, %10 : vector<8x1xf32>
    %12 = vector.broadcast %11 : vector<8x1xf32> to vector<8x128xf32>
    %13 = arith.subf %5, %12 : vector<8x128xf32>
    %14 = arith.mulf %13, %13 : vector<8x128xf32>
    %cst_11 = arith.constant dense<0.000000e+00> : vector<8xf32>
    %15 = vector.multi_reduction <add>, %14, %cst_11 [1] : vector<8x128xf32> to vector<8xf32>
    %16 = vector.shape_cast %15 : vector<8xf32> to vector<8x1xf32>
    %cst_12 = arith.constant 1.280000e+02 : f32
    %17 = vector.broadcast %cst_12 : f32 to vector<8x1xf32>
    %18 = arith.divf %16, %17 : vector<8x1xf32>
    %cst_13 = arith.constant 9.99999974E-6 : f32
    %19 = vector.broadcast %cst_13 : f32 to vector<8x1xf32>
    %20 = arith.addf %18, %19 : vector<8x1xf32>
    %21 = math.rsqrt %20 : vector<8x1xf32>
    %22 = vector.broadcast %21 : vector<8x1xf32> to vector<8x128xf32>
    %23 = arith.mulf %13, %22 : vector<8x128xf32>
    %24 = vector.broadcast %6 : vector<1x128xf32> to vector<8x128xf32>
    %25 = arith.mulf %23, %24 : vector<8x128xf32>
    %26 = vector.broadcast %7 : vector<1x128xf32> to vector<8x128xf32>
    %27 = arith.addf %25, %26 : vector<8x128xf32>
    %cst_14 = arith.constant 0.00999999977 : f32
    %28 = vector.broadcast %cst_14 : f32 to vector<8x128xf32>
    %29 = arith.mulf %28, %27 : vector<8x128xf32>
    %30 = arith.maximumf %27, %29 : vector<8x128xf32>
    %c0_15 = arith.constant 0 : index
    %c0_16 = arith.constant 0 : index
    %31 = vector.load %arg6[%c0_15, %c0_16] : memref<128x128xf32, #tpu.memory_space<vmem>>, vector<128x128xf32>
    %cst_17 = arith.constant dense<0.000000e+00> : vector<8x128xf32>
    %32 = tpu.matmul %30, %31, %cst_17 {dimension_numbers = #tpu.dot_dimension_numbers<[1], [0], [0], [1], [0, 0, 1, 1], [], []>} : vector<8x128xf32>, vector<128x128xf32>, vector<8x128xf32> -> vector<8x128xf32>
    %c0_18 = arith.constant 0 : index
    %c0_19 = arith.constant 0 : index
    %33 = vector.load %arg7[%c0_18, %c0_19] : memref<1x128xf32, #tpu.memory_space<vmem>>, vector<1x128xf32>
    %34 = vector.broadcast %33 : vector<1x128xf32> to vector<8x128xf32>
    %35 = arith.addf %32, %34 : vector<8x128xf32>
    %c0_20 = arith.constant 0 : index
    %c0_21 = arith.constant 0 : index
    %36 = vector.load %arg8[%c0_20, %c0_21] : memref<1x128xf32, #tpu.memory_space<vmem>>, vector<1x128xf32>
    %c0_22 = arith.constant 0 : index
    %c0_23 = arith.constant 0 : index
    %37 = vector.load %arg9[%c0_22, %c0_23] : memref<1x128xf32, #tpu.memory_space<vmem>>, vector<1x128xf32>
    %cst_24 = arith.constant dense<0.000000e+00> : vector<8xf32>
    %38 = vector.multi_reduction <add>, %35, %cst_24 [1] : vector<8x128xf32> to vector<8xf32>
    %39 = vector.shape_cast %38 : vector<8xf32> to vector<8x1xf32>
    %cst_25 = arith.constant 1.280000e+02 : f32
    %40 = vector.broadcast %cst_25 : f32 to vector<8x1xf32>
    %41 = arith.divf %39, %40 : vector<8x1xf32>
    %42 = vector.broadcast %41 : vector<8x1xf32> to vector<8x128xf32>
    %43 = arith.subf %35, %42 : vector<8x128xf32>
    %44 = arith.mulf %43, %43 : vector<8x128xf32>
    %cst_26 = arith.constant dense<0.000000e+00> : vector<8xf32>
    %45 = vector.multi_reduction <add>, %44, %cst_26 [1] : vector<8x128xf32> to vector<8xf32>
    %46 = vector.shape_cast %45 : vector<8xf32> to vector<8x1xf32>
    %cst_27 = arith.constant 1.280000e+02 : f32
    %47 = vector.broadcast %cst_27 : f32 to vector<8x1xf32>
    %48 = arith.divf %46, %47 : vector<8x1xf32>
    %cst_28 = arith.constant 9.99999974E-6 : f32
    %49 = vector.broadcast %cst_28 : f32 to vector<8x1xf32>
    %50 = arith.addf %48, %49 : vector<8x1xf32>
    %51 = math.rsqrt %50 : vector<8x1xf32>
    %52 = vector.broadcast %51 : vector<8x1xf32> to vector<8x128xf32>
    %53 = arith.mulf %43, %52 : vector<8x128xf32>
    %54 = vector.broadcast %36 : vector<1x128xf32> to vector<8x128xf32>
    %55 = arith.mulf %53, %54 : vector<8x128xf32>
    %56 = vector.broadcast %37 : vector<1x128xf32> to vector<8x128xf32>
    %57 = arith.addf %55, %56 : vector<8x128xf32>
    %cst_29 = arith.constant 0.00999999977 : f32
    %58 = vector.broadcast %cst_29 : f32 to vector<8x128xf32>
    %59 = arith.mulf %58, %57 : vector<8x128xf32>
    %60 = arith.maximumf %57, %59 : vector<8x128xf32>
    %c0_30 = arith.constant 0 : index
    %c0_31 = arith.constant 0 : index
    %61 = vector.load %arg10[%c0_30, %c0_31] : memref<128x64xf32, #tpu.memory_space<vmem>>, vector<128x64xf32>
    %cst_32 = arith.constant dense<0.000000e+00> : vector<8x64xf32>
    %62 = tpu.matmul %60, %61, %cst_32 {dimension_numbers = #tpu.dot_dimension_numbers<[1], [0], [0], [1], [0, 0, 1, 1], [], []>} : vector<8x128xf32>, vector<128x64xf32>, vector<8x64xf32> -> vector<8x64xf32>
    %c0_33 = arith.constant 0 : index
    %c0_34 = arith.constant 0 : index
    %63 = vector.load %arg11[%c0_33, %c0_34] : memref<1x64xf32, #tpu.memory_space<vmem>>, vector<1x64xf32>
    %64 = vector.broadcast %63 : vector<1x64xf32> to vector<8x64xf32>
    %65 = arith.addf %62, %64 : vector<8x64xf32>
    %c0_35 = arith.constant 0 : index
    %c0_36 = arith.constant 0 : index
    %66 = vector.load %arg12[%c0_35, %c0_36] : memref<8x64xf32, #tpu.memory_space<vmem>>, vector<8x64xf32>
    tpu.vector_store %arg12[%c0_35, %c0_36], %65 {strides = array<i32>} : memref<8x64xf32, #tpu.memory_space<vmem>>, vector<8x64xf32>,
    return
  }
  func.func @transform_0(%arg0: i32) -> (i32, i32) {
    %c0_i32 = arith.constant 0 : i32
    %c0_i32_0 = arith.constant 0 : i32
    return %arg0, %c0_i32 : i32, i32
  }
  func.func @transform_1(%arg0: i32) -> (i32, i32) {
    %c0_i32 = arith.constant 0 : i32
    %c0_i32_0 = arith.constant 0 : i32
    %c0_i32_1 = arith.constant 0 : i32
    return %c0_i32, %c0_i32_0 : i32, i32
  }
  func.func @transform_2(%arg0: i32) -> (i32, i32) {
    %c0_i32 = arith.constant 0 : i32
    %c0_i32_0 = arith.constant 0 : i32
    %c0_i32_1 = arith.constant 0 : i32
    return %c0_i32, %c0_i32_0 : i32, i32
  }
  func.func @transform_3(%arg0: i32) -> (i32, i32) {
    %c0_i32 = arith.constant 0 : i32
    %c0_i32_0 = arith.constant 0 : i32
    %c0_i32_1 = arith.constant 0 : i32
    return %c0_i32, %c0_i32_0 : i32, i32
  }
  func.func @transform_4(%arg0: i32) -> (i32, i32) {
    %c0_i32 = arith.constant 0 : i32
    %c0_i32_0 = arith.constant 0 : i32
    %c0_i32_1 = arith.constant 0 : i32
    return %c0_i32, %c0_i32_0 : i32, i32
  }
  func.func @transform_5(%arg0: i32) -> (i32, i32) {
    %c0_i32 = arith.constant 0 : i32
    %c0_i32_0 = arith.constant 0 : i32
    %c0_i32_1 = arith.constant 0 : i32
    return %c0_i32, %c0_i32_0 : i32, i32
  }
  func.func @transform_6(%arg0: i32) -> (i32, i32) {
    %c0_i32 = arith.constant 0 : i32
    %c0_i32_0 = arith.constant 0 : i32
    %c0_i32_1 = arith.constant 0 : i32
    return %c0_i32, %c0_i32_0 : i32, i32
  }
  func.func @transform_7(%arg0: i32) -> (i32, i32) {
    %c0_i32 = arith.constant 0 : i32
    %c0_i32_0 = arith.constant 0 : i32
    %c0_i32_1 = arith.constant 0 : i32
    return %c0_i32, %c0_i32_0 : i32, i32
  }
  func.func @transform_8(%arg0: i32) -> (i32, i32) {
    %c0_i32 = arith.constant 0 : i32
    %c0_i32_0 = arith.constant 0 : i32
    %c0_i32_1 = arith.constant 0 : i32
    return %c0_i32, %c0_i32_0 : i32, i32
  }
  func.func @transform_9(%arg0: i32) -> (i32, i32) {
    %c0_i32 = arith.constant 0 : i32
    %c0_i32_0 = arith.constant 0 : i32
    %c0_i32_1 = arith.constant 0 : i32
    return %c0_i32, %c0_i32_0 : i32, i32
  }
  func.func @transform_10(%arg0: i32) -> (i32, i32) {
    %c0_i32 = arith.constant 0 : i32
    %c0_i32_0 = arith.constant 0 : i32
    %c0_i32_1 = arith.constant 0 : i32
    return %c0_i32, %c0_i32_0 : i32, i32
  }
  func.func @transform_11(%arg0: i32) -> (i32, i32) {
    %c0_i32 = arith.constant 0 : i32
    %c0_i32_0 = arith.constant 0 : i32
    return %arg0, %c0_i32 : i32, i32
  }
}

module attributes {stable_mosaic.version = 11 : i64} {
  func.func @_transition_kernel(%arg0: i32, %arg1: memref<8x64xf32, #tpu.memory_space<vmem>>, %arg2: memref<64x128xf32, #tpu.memory_space<vmem>>, %arg3: memref<1x128xf32, #tpu.memory_space<vmem>>, %arg4: memref<1x128xf32, #tpu.memory_space<vmem>>, %arg5: memref<1x128xf32, #tpu.memory_space<vmem>>, %arg6: memref<128x128xf32, #tpu.memory_space<vmem>>, %arg7: memref<1x128xf32, #tpu.memory_space<vmem>>, %arg8: memref<1x128xf32, #tpu.memory_space<vmem>>, %arg9: memref<1x128xf32, #tpu.memory_space<vmem>>, %arg10: memref<128x64xf32, #tpu.memory_space<vmem>>, %arg11: memref<1x64xf32, #tpu.memory_space<vmem>>, %arg12: memref<8x64xf32, #tpu.memory_space<vmem>>) attributes {dimension_semantics = [#tpu.dimension_semantics<parallel>], iteration_bounds = array<i64: 1>, scalar_prefetch = 0 : i64, scratch_operands = 0 : i64, tpu.core_type = #tpu.core_type<tc>, window_params = [{transform_indices = @transform_0, window_bounds = array<i64: 8, 64>}, {pipeline_mode = #tpu.pipeline_mode<synchronous>, transform_indices = @transform_1, window_bounds = array<i64: 64, 128>}, {pipeline_mode = #tpu.pipeline_mode<synchronous>, transform_indices = @transform_2, window_bounds = array<i64: 1, 128>}, {pipeline_mode = #tpu.pipeline_mode<synchronous>, transform_indices = @transform_3, window_bounds = array<i64: 1, 128>}, {pipeline_mode = #tpu.pipeline_mode<synchronous>, transform_indices = @transform_4, window_bounds = array<i64: 1, 128>}, {pipeline_mode = #tpu.pipeline_mode<synchronous>, transform_indices = @transform_5, window_bounds = array<i64: 128, 128>}, {pipeline_mode = #tpu.pipeline_mode<synchronous>, transform_indices = @transform_6, window_bounds = array<i64: 1, 128>}, {pipeline_mode = #tpu.pipeline_mode<synchronous>, transform_indices = @transform_7, window_bounds = array<i64: 1, 128>}, {pipeline_mode = #tpu.pipeline_mode<synchronous>, transform_indices = @transform_8, window_bounds = array<i64: 1, 128>}, {pipeline_mode = #tpu.pipeline_mode<synchronous>, transform_indices = @transform_9, window_bounds = array<i64: 128, 64>}, {pipeline_mode = #tpu.pipeline_mode<synchronous>, transform_indices = @transform_10, window_bounds = array<i64: 1, 64>}, {transform_indices = @transform_11, window_bounds = array<i64: 8, 64>}]} {
    %c0 = arith.constant 0 : index
    %c0_0 = arith.constant 0 : index
    %0 = vector.load %arg1[%c0, %c0_0] : memref<8x64xf32, #tpu.memory_space<vmem>>, vector<8x64xf32>
    %c0_1 = arith.constant 0 : index
    %c0_2 = arith.constant 0 : index
    %1 = vector.load %arg2[%c0_1, %c0_2] : memref<64x128xf32, #tpu.memory_space<vmem>>, vector<64x128xf32>
    %cst = arith.constant dense<0.000000e+00> : vector<8x128xf32>
    %2 = tpu.matmul %0, %1, %cst {dimension_numbers = #tpu.dot_dimension_numbers<[1], [0], [0], [1], [0, 0, 1, 1], [], []>} : vector<8x64xf32>, vector<64x128xf32>, vector<8x128xf32> -> vector<8x128xf32>
    %c0_3 = arith.constant 0 : index
    %c0_4 = arith.constant 0 : index
    %3 = vector.load %arg3[%c0_3, %c0_4] : memref<1x128xf32, #tpu.memory_space<vmem>>, vector<1x128xf32>
    %4 = vector.broadcast %3 : vector<1x128xf32> to vector<8x128xf32>
    %5 = arith.addf %2, %4 : vector<8x128xf32>
    %c0_5 = arith.constant 0 : index
    %c0_6 = arith.constant 0 : index
    %6 = vector.load %arg4[%c0_5, %c0_6] : memref<1x128xf32, #tpu.memory_space<vmem>>, vector<1x128xf32>
    %c0_7 = arith.constant 0 : index
    %c0_8 = arith.constant 0 : index
    %7 = vector.load %arg5[%c0_7, %c0_8] : memref<1x128xf32, #tpu.memory_space<vmem>>, vector<1x128xf32>
    %cst_9 = arith.constant dense<0.000000e+00> : vector<8xf32>
    %8 = vector.multi_reduction <add>, %5, %cst_9 [1] : vector<8x128xf32> to vector<8xf32>
    %9 = vector.shape_cast %8 : vector<8xf32> to vector<8x1xf32>
    %cst_10 = arith.constant 1.280000e+02 : f32
    %10 = vector.broadcast %cst_10 : f32 to vector<8x1xf32>
    %11 = arith.divf %9, %10 : vector<8x1xf32>
    %12 = vector.broadcast %11 : vector<8x1xf32> to vector<8x128xf32>
    %13 = arith.subf %5, %12 : vector<8x128xf32>
    %14 = arith.mulf %13, %13 : vector<8x128xf32>
    %cst_11 = arith.constant dense<0.000000e+00> : vector<8xf32>
    %15 = vector.multi_reduction <add>, %14, %cst_11 [1] : vector<8x128xf32> to vector<8xf32>
    %16 = vector.shape_cast %15 : vector<8xf32> to vector<8x1xf32>
    %cst_12 = arith.constant 1.280000e+02 : f32
    %17 = vector.broadcast %cst_12 : f32 to vector<8x1xf32>
    %18 = arith.divf %16, %17 : vector<8x1xf32>
    %cst_13 = arith.constant 9.99999974E-6 : f32
    %19 = vector.broadcast %cst_13 : f32 to vector<8x1xf32>
    %20 = arith.addf %18, %19 : vector<8x1xf32>
    %21 = math.rsqrt %20 : vector<8x1xf32>
    %22 = vector.broadcast %21 : vector<8x1xf32> to vector<8x128xf32>
    %23 = arith.mulf %13, %22 : vector<8x128xf32>
    %24 = vector.broadcast %6 : vector<1x128xf32> to vector<8x128xf32>
    %25 = arith.mulf %23, %24 : vector<8x128xf32>
    %26 = vector.broadcast %7 : vector<1x128xf32> to vector<8x128xf32>
    %27 = arith.addf %25, %26 : vector<8x128xf32>
    %cst_14 = arith.constant 0.00999999977 : f32
    %28 = vector.broadcast %cst_14 : f32 to vector<8x128xf32>
    %29 = arith.mulf %28, %27 : vector<8x128xf32>
    %30 = arith.maximumf %27, %29 : vector<8x128xf32>
    %c0_15 = arith.constant 0 : index
    %c0_16 = arith.constant 0 : index
    %31 = vector.load %arg6[%c0_15, %c0_16] : memref<128x128xf32, #tpu.memory_space<vmem>>, vector<128x128xf32>
    %cst_17 = arith.constant dense<0.000000e+00> : vector<8x128xf32>
    %32 = tpu.matmul %30, %31, %cst_17 {dimension_numbers = #tpu.dot_dimension_numbers<[1], [0], [0], [1], [0, 0, 1, 1], [], []>} : vector<8x128xf32>, vector<128x128xf32>, vector<8x128xf32> -> vector<8x128xf32>
    %c0_18 = arith.constant 0 : index
    %c0_19 = arith.constant 0 : index
    %33 = vector.load %arg7[%c0_18, %c0_19] : memref<1x128xf32, #tpu.memory_space<vmem>>, vector<1x128xf32>
    %34 = vector.broadcast %33 : vector<1x128xf32> to vector<8x128xf32>
    %35 = arith.addf %32, %34 : vector<8x128xf32>
    %c0_20 = arith.constant 0 : index
    %c0_21 = arith.constant 0 : index
    %36 = vector.load %arg8[%c0_20, %c0_21] : memref<1x128xf32, #tpu.memory_space<vmem>>, vector<1x128xf32>
    %c0_22 = arith.constant 0 : index
    %c0_23 = arith.constant 0 : index
    %37 = vector.load %arg9[%c0_22, %c0_23] : memref<1x128xf32, #tpu.memory_space<vmem>>, vector<1x128xf32>
    %cst_24 = arith.constant dense<0.000000e+00> : vector<8xf32>
    %38 = vector.multi_reduction <add>, %35, %cst_24 [1] : vector<8x128xf32> to vector<8xf32>
    %39 = vector.shape_cast %38 : vector<8xf32> to vector<8x1xf32>
    %cst_25 = arith.constant 1.280000e+02 : f32
    %40 = vector.broadcast %cst_25 : f32 to vector<8x1xf32>
    %41 = arith.divf %39, %40 : vector<8x1xf32>
    %42 = vector.broadcast %41 : vector<8x1xf32> to vector<8x128xf32>
    %43 = arith.subf %35, %42 : vector<8x128xf32>
    %44 = arith.mulf %43, %43 : vector<8x128xf32>
    %cst_26 = arith.constant dense<0.000000e+00> : vector<8xf32>
    %45 = vector.multi_reduction <add>, %44, %cst_26 [1] : vector<8x128xf32> to vector<8xf32>
    %46 = vector.shape_cast %45 : vector<8xf32> to vector<8x1xf32>
    %cst_27 = arith.constant 1.280000e+02 : f32
    %47 = vector.broadcast %cst_27 : f32 to vector<8x1xf32>
    %48 = arith.divf %46, %47 : vector<8x1xf32>
    %cst_28 = arith.constant 9.99999974E-6 : f32
    %49 = vector.broadcast %cst_28 : f32 to vector<8x1xf32>
    %50 = arith.addf %48, %49 : vector<8x1xf32>
    %51 = math.rsqrt %50 : vector<8x1xf32>
    %52 = vector.broadcast %51 : vector<8x1xf32> to vector<8x128xf32>
    %53 = arith.mulf %43, %52 : vector<8x128xf32>
    %54 = vector.broadcast %36 : vector<1x128xf32> to vector<8x128xf32>
    %55 = arith.mulf %53, %54 : vector<8x128xf32>
    %56 = vector.broadcast %37 : vector<1x128xf32> to vector<8x128xf32>
    %57 = arith.addf %55, %56 : vector<8x128xf32>
    %cst_29 = arith.constant 0.00999999977 : f32
    %58 = vector.broadcast %cst_29 : f32 to vector<8x128xf32>
    %59 = arith.mulf %58, %57 : vector<8x128xf32>
    %60 = arith.maximumf %57, %59 : vector<8x128xf32>
    %c0_30 = arith.constant 0 : index
    %c0_31 = arith.constant 0 : index
    %61 = vector.load %arg10[%c0_30, %c0_31] : memref<128x64xf32, #tpu.memory_space<vmem>>, vector<128x64xf32>
    %cst_32 = arith.constant dense<0.000000e+00> : vector<8x64xf32>
    %62 = tpu.matmul %60, %61, %cst_32 {dimension_numbers = #tpu.dot_dimension_numbers<[1], [0], [0], [1], [0, 0, 1, 1], [], []>} : vector<8x128xf32>, vector<128x64xf32>, vector<8x64xf32> -> vector<8x64xf32>
    %c0_33 = arith.constant 0 : index
    %c0_34 = arith.constant 0 : index
    %63 = vector.load %arg11[%c0_33, %c0_34] : memref<1x64xf32, #tpu.memory_space<vmem>>, vector<1x64xf32>
    %64 = vector.broadcast %63 : vector<1x64xf32> to vector<8x64xf32>
    %65 = arith.addf %62, %64 : vector<8x64xf32>
    %c0_35 = arith.constant 0 : index
    %c0_36 = arith.constant 0 : index
    %66 = vector.load %arg12[%c0_35, %c0_36] : memref<8x64xf32, #tpu.memory_space<vmem>>, vector<8x64xf32>
    tpu.vector_store %arg12[%c0_35, %c0_36], %65 {strides = array<i32>} : memref<8x64xf32, #tpu.memory_space<vmem>>, vector<8x64xf32>,
    return
  }
  func.func @transform_0(%arg0: i32) -> (i32, i32) {
    %c0_i32 = arith.constant 0 : i32
    %c0_i32_0 = arith.constant 0 : i32
    return %arg0, %c0_i32 : i32, i32
  }
  func.func @transform_1(%arg0: i32) -> (i32, i32) {
    %c0_i32 = arith.constant 0 : i32
    %c0_i32_0 = arith.constant 0 : i32
    %c0_i32_1 = arith.constant 0 : i32
    return %c0_i32, %c0_i32_0 : i32, i32
  }
  func.func @transform_2(%arg0: i32) -> (i32, i32) {
    %c0_i32 = arith.constant 0 : i32
    %c0_i32_0 = arith.constant 0 : i32
    %c0_i32_1 = arith.constant 0 : i32
    return %c0_i32, %c0_i32_0 : i32, i32
  }
  func.func @transform_3(%arg0: i32) -> (i32, i32) {
    %c0_i32 = arith.constant 0 : i32
    %c0_i32_0 = arith.constant 0 : i32
    %c0_i32_1 = arith.constant 0 : i32
    return %c0_i32, %c0_i32_0 : i32, i32
  }
  func.func @transform_4(%arg0: i32) -> (i32, i32) {
    %c0_i32 = arith.constant 0 : i32
    %c0_i32_0 = arith.constant 0 : i32
    %c0_i32_1 = arith.constant 0 : i32
    return %c0_i32, %c0_i32_0 : i32, i32
  }
  func.func @transform_5(%arg0: i32) -> (i32, i32) {
    %c0_i32 = arith.constant 0 : i32
    %c0_i32_0 = arith.constant 0 : i32
    %c0_i32_1 = arith.constant 0 : i32
    return %c0_i32, %c0_i32_0 : i32, i32
  }
  func.func @transform_6(%arg0: i32) -> (i32, i32) {
    %c0_i32 = arith.constant 0 : i32
    %c0_i32_0 = arith.constant 0 : i32
    %c0_i32_1 = arith.constant 0 : i32
    return %c0_i32, %c0_i32_0 : i32, i32
  }
  func.func @transform_7(%arg0: i32) -> (i32, i32) {
    %c0_i32 = arith.constant 0 : i32
    %c0_i32_0 = arith.constant 0 : i32
    %c0_i32_1 = arith.constant 0 : i32
    return %c0_i32, %c0_i32_0 : i32, i32
  }
  func.func @transform_8(%arg0: i32) -> (i32, i32) {
    %c0_i32 = arith.constant 0 : i32
    %c0_i32_0 = arith.constant 0 : i32
    %c0_i32_1 = arith.constant 0 : i32
    return %c0_i32, %c0_i32_0 : i32, i32
  }
  func.func @transform_9(%arg0: i32) -> (i32, i32) {
    %c0_i32 = arith.constant 0 : i32
    %c0_i32_0 = arith.constant 0 : i32
    %c0_i32_1 = arith.constant 0 : i32
    return %c0_i32, %c0_i32_0 : i32, i32
  }
  func.func @transform_10(%arg0: i32) -> (i32, i32) {
    %c0_i32 = arith.constant 0 : i32
    %c0_i32_0 = arith.constant 0 : i32
    %c0_i32_1 = arith.constant 0 : i32
    return %c0_i32, %c0_i32_0 : i32, i32
  }
  func.func @transform_11(%arg0: i32) -> (i32, i32) {
    %c0_i32 = arith.constant 0 : i32
    %c0_i32_0 = arith.constant 0 : i32
    return %arg0, %c0_i32 : i32, i32
  }
}

</mosaic_0001>

<bundles_post_ra>
// kernel: tpu_custom_call.1
= control target key start
LH: loop header
LB: loop body
LE: loop exit
PB: predicated region body
PF: predicated region fallthrough
CT: control target
= control target key end

     0   :  { %16 = vsyncpa [#allocation3], 0  ;;  %v562_v1 = vmov 0.0   ;;  %vm563_vm0 = vmmov 0   ;;  %vm55_vm1 = vcmask 523264   ;;  %s822_s0 = inlined_call_operand.vmem [shape: f32[4,64], index: 0, kind: input, shape index: {}]   ;;  %s823_s1 = inlined_call_operand.vmem [shape: f32[64,128], index: 1, kind: input, shape index: {}]   ;;  %s824_s2 = inlined_call_operand.vmem [shape: f32[1,128], index: 2, kind: input, shape index: {}]   ;;  %s825_s3 = inlined_call_operand.vmem [shape: f32[1,128], index: 3, kind: input, shape index: {}]   ;;  %s826_s4 = inlined_call_operand.vmem [shape: f32[1,128], index: 4, kind: input, shape index: {}]   ;;  %s827_s5 = inlined_call_operand.vmem [shape: f32[128,128], index: 5, kind: input, shape index: {}]   ;;  %s828_s6 = inlined_call_operand.vmem [shape: f32[1,128], index: 6, kind: input, shape index: {}]   ;;  %s829_s7 = inlined_call_operand.vmem [shape: f32[1,128], index: 7, kind: input, shape index: {}]   ;;  %s830_s8 = inlined_call_operand.vmem [shape: f32[1,128], index: 8, kind: input, shape index: {}]   ;;  %s831_s9 = inlined_call_operand.vmem [shape: f32[128,64], index: 9, kind: input, shape index: {}]   ;;  %s832_s10 = inlined_call_operand.vmem [shape: f32[1,64], index: 10, kind: input, shape index: {}]   ;;  %s833_s11 = inlined_call_operand.hbm [shape: f32[4,64], index: 11, kind: output, shape index: {}]  }
   0x1   :  { %v47_v0 = vld [vmem:[%s823_s1 + $0x38] sm:$0xff]  ;;  %442 = vmatprep.subr.mxu0 %v562_v1  ;;  %v46_v2 = vld [vmem:[%s823_s1 + $0x30] sm:$0xff]  ;;  %458 = vmatprep.mubr.msk.f32.mxu0 %vm563_vm0, %v562_v1  ;;  %v45_v3 = vld [vmem:[%s823_s1 + $0x28] sm:$0xff] }
   0x2   :  { %443 = vmatpush3.msra.mxu0 %v47_v0  ;;  %461 = vmatprep.subr.mxu1 %v562_v1  ;;  %v44_v4 = vld [vmem:[%s823_s1 + $0x20] sm:$0xff]  ;;  %v43_v5 = vld [vmem:[%s823_s1 + $0x18] sm:$0xff]  ;;  %v42_v6 = vld [vmem:[%s823_s1 + $0x10] sm:$0xff] }
   0x3   :  { %444 = vmatprep.subr.mxu0 %v562_v1  ;;  %493 = vmatprep.mubr.msk.f32.mxu1 %vm563_vm0, %v562_v1  ;;  %v41_v7 = vld [vmem:[%s823_s1 + $0x8] sm:$0xff]  ;;  %v40_v8 = vld [vmem:[%s823_s1] sm:$0xff]  ;;  %v174_v14 = vld [vmem:[%s827_s5 + $0x78] sm:$0xff] }
   0x4   :  { %445 = vmatpush3.msra.mxu0 %v46_v2  ;;  %v39_v9 = vld [vmem:[%s822_s0] sm:$0xff]  ;;  %v173_v15 = vld [vmem:[%s827_s5 + $0x70] sm:$0xff]  ;;  %462 = vmatpush3.msra.mxu1 %v174_v14  ;;  %v172_v20 = vld [vmem:[%s827_s5 + $0x68] sm:$0xff] }
   0x5   :  { %446 = vmatprep.subr.mxu0 %v562_v1  ;;  %v391_v10 = vld [vmem:[%s824_s2] ss:$0 sm:$0xff]  ;;  %463 = vmatprep.subr.mxu1 %v562_v1  ;;  %v170_v22 = vld [vmem:[%s827_s5 + $0x58] sm:$0xff]  ;;  %v169_v23 = vld [vmem:[%s827_s5 + $0x50] sm:$0xff] }
   0x6   :  { %447 = vmatpush3.msra.mxu0 %v45_v3  ;;  %464 = vmatpush3.msra.mxu1 %v173_v15  ;;  %v171_v21 = vld [vmem:[%s827_s5 + $0x60] sm:$0xff]  ;;  %v168_v24 = vld [vmem:[%s827_s5 + $0x48] sm:$0xff]  ;;  %v166_v26 = vld [vmem:[%s827_s5 + $0x38] sm:$0xff] }
   0x7   :  { %448 = vmatprep.subr.mxu0 %v562_v1  ;;  %465 = vmatprep.subr.mxu1 %v562_v1  ;;  %v167_v25 = vld [vmem:[%s827_s5 + $0x40] sm:$0xff]  ;;  %v165_v27 = vld [vmem:[%s827_s5 + $0x30] sm:$0xff]  ;;  %v164_v28 = vld [vmem:[%s827_s5 + $0x28] sm:$0xff] }
   0x8   :  { %449 = vmatpush3.msra.mxu0 %v44_v4  ;;  %466 = vmatpush3.msra.mxu1 %v172_v20  ;;  %v163_v29 = vld [vmem:[%s827_s5 + $0x20] sm:$0xff]  ;;  %v162_v30 = vld [vmem:[%s827_s5 + $0x18] sm:$0xff]  ;;  %v161_v31 = vld [vmem:[%s827_s5 + $0x10] sm:$0xff] }
   0x9   :  { %450 = vmatprep.subr.mxu0 %v562_v1  ;;  %467 = vmatprep.subr.mxu1 %v562_v1  ;;  %v160_v32 = vld [vmem:[%s827_s5 + $0x8] sm:$0xff]  ;;  %v159_v33 = vld [vmem:[%s827_s5] sm:$0xff]  ;;  %v296_v49 = vld [vmem:[%s831_s9 + $0x78] sm:$0xff] }
   0xa   :  { %451 = vmatpush3.msra.mxu0 %v43_v5  ;;  %468 = vmatpush3.msra.mxu1 %v171_v21  ;;  %v393_v38 = vld [vmem:[%s825_s3] ss:$0 sm:$0xff]  ;;  %v295_v50 = vld [vmem:[%s831_s9 + $0x70] sm:$0xff]  ;;  %v294_v55 = vld [vmem:[%s831_s9 + $0x68] sm:$0xff] }
   0xb   :  { %452 = vmatprep.subr.mxu0 %v562_v1  ;;  %469 = vmatprep.subr.mxu1 %v562_v1  ;;  %v394_v40 = vld [vmem:[%s826_s4] ss:$0 sm:$0xff]  ;;  %v292_v57 = vld [vmem:[%s831_s9 + $0x58] sm:$0xff]  ;;  %v291_v58 = vld [vmem:[%s831_s9 + $0x50] sm:$0xff] }
   0xc   :  { %453 = vmatpush3.msra.mxu0 %v42_v6  ;;  %470 = vmatpush3.msra.mxu1 %v170_v22  ;;  %v395_v45 = vld [vmem:[%s828_s6] ss:$0 sm:$0xff]  ;;  %v290_v59 = vld [vmem:[%s831_s9 + $0x48] sm:$0xff]  ;;  %v288_v61 = vld [vmem:[%s831_s9 + $0x38] sm:$0xff] }
   0xd   :  { %454 = vmatprep.subr.mxu0 %v562_v1  ;;  %471 = vmatprep.subr.mxu1 %v562_v1  ;;  %v293_v56 = vld [vmem:[%s831_s9 + $0x60] sm:$0xff]  ;;  %v287_v62 = vld [vmem:[%s831_s9 + $0x30] sm:$0xff]  ;;  %v286_v63 = vld [vmem:[%s831_s9 + $0x28] sm:$0xff] }
   0xe   :  { %455 = vmatpush3.msra.mxu0 %v41_v7  ;;  %472 = vmatpush3.msra.mxu1 %v169_v23  ;;  %v289_v60 = vld [vmem:[%s831_s9 + $0x40] sm:$0xff]  ;;  %v284_v2 = vld [vmem:[%s831_s9 + $0x18] sm:$0xff]  ;;  %v283_v3 = vld [vmem:[%s831_s9 + $0x10] sm:$0xff] }
   0xf   :  { %456 = vmatprep.subr.mxu0 %v562_v1  ;;  %473 = vmatprep.subr.mxu1 %v562_v1  ;;  %v285_v0 = vld [vmem:[%s831_s9 + $0x20] sm:$0xff]  ;;  %v282_v4 = vld [vmem:[%s831_s9 + $0x8] sm:$0xff] }
  0x10   :  { %457 = vmatpush3.msra.mxu0 %v40_v8  ;;  %474 = vmatpush3.msra.mxu1 %v168_v24  ;;  %v281_v5 = vld [vmem:[%s831_s9] sm:$0xff] }
  0x11   :  { %459 = vmatmul.mubr.msk.f32.vlgmr.msra.gmra.mxu0 %vm55_vm1, %v39_v9  ;;  %496 = vmatprep.subr.mxu0 %v562_v1 }
  0x12   :  { %528 = vmatprep.mubr.msk.f32.mxu0 %vm563_vm0, %v562_v1  ;;  %475 = vmatprep.subr.mxu1 %v562_v1 }
  0x13   :  { %476 = vmatpush3.msra.mxu1 %v167_v25  ;;  %497 = vmatpush3.msra.mxu0 %v296_v49 }
  0x14   :  { %477 = vmatprep.subr.mxu1 %v562_v1  ;;  %498 = vmatprep.subr.mxu0 %v562_v1 }
  0x15   :  { %478 = vmatpush3.msra.mxu1 %v166_v26  ;;  %499 = vmatpush3.msra.mxu0 %v295_v50 }
  0x16   :  { %479 = vmatprep.subr.mxu1 %v562_v1  ;;  %500 = vmatprep.subr.mxu0 %v562_v1 }
  0x17   :  { %480 = vmatpush3.msra.mxu1 %v165_v27  ;;  %501 = vmatpush3.msra.mxu0 %v294_v55 }
  0x18   :  { %481 = vmatprep.subr.mxu1 %v562_v1  ;;  %502 = vmatprep.subr.mxu0 %v562_v1 }
  0x19   :  { %482 = vmatpush3.msra.mxu1 %v164_v28  ;;  %503 = vmatpush3.msra.mxu0 %v293_v56 }
  0x1a   :  { %483 = vmatprep.subr.mxu1 %v562_v1  ;;  %504 = vmatprep.subr.mxu0 %v562_v1 }
  0x1b   :  { %484 = vmatpush3.msra.mxu1 %v163_v29  ;;  %505 = vmatpush3.msra.mxu0 %v292_v57 }
  0x1c   :  { %485 = vmatprep.subr.mxu1 %v562_v1  ;;  %506 = vmatprep.subr.mxu0 %v562_v1 }
  0x1d   :  { %486 = vmatpush3.msra.mxu1 %v162_v30  ;;  %507 = vmatpush3.msra.mxu0 %v291_v58 }
  0x1e   :  { %487 = vmatprep.subr.mxu1 %v562_v1  ;;  %508 = vmatprep.subr.mxu0 %v562_v1 }
  0x1f   :  { %488 = vmatpush3.msra.mxu1 %v161_v31  ;;  %509 = vmatpush3.msra.mxu0 %v290_v59 }
  0x20   :  { %489 = vmatprep.subr.mxu1 %v562_v1  ;;  %510 = vmatprep.subr.mxu0 %v562_v1 }
  0x21   :  { %490 = vmatpush3.msra.mxu1 %v160_v32  ;;  %511 = vmatpush3.msra.mxu0 %v289_v60 }
  0x22   :  { %491 = vmatprep.subr.mxu1 %v562_v1  ;;  %512 = vmatprep.subr.mxu0 %v562_v1 }
  0x23   :  { %492 = vmatpush3.msra.mxu1 %v159_v33  ;;  %513 = vmatpush3.msra.mxu0 %v288_v61 }
  0x24   :  { %514 = vmatprep.subr.mxu0 %v562_v1 }
  0x25   :  { %515 = vmatpush3.msra.mxu0 %v287_v62 }
  0x26   :  { %516 = vmatprep.subr.mxu0 %v562_v1 }
  0x27   :  { %517 = vmatpush3.msra.mxu0 %v286_v63 }
  0x28   :  { %518 = vmatprep.subr.mxu0 %v562_v1 }
  0x29   :  { %519 = vmatpush3.msra.mxu0 %v285_v0 }
  0x2a   :  { %520 = vmatprep.subr.mxu0 %v562_v1 }
  0x2b   :  { %521 = vmatpush3.msra.mxu0 %v284_v2 }
  0x2c   :  { %522 = vmatprep.subr.mxu0 %v562_v1 }
  0x2d   :  { %523 = vmatpush3.msra.mxu0 %v283_v3 }
  0x2e   :  { %524 = vmatprep.subr.mxu0 %v562_v1 }
  0x2f   :  { %525 = vmatpush3.msra.mxu0 %v282_v4 }
  0x30   :  { %526 = vmatprep.subr.mxu0 %v562_v1  ;;  %v398_v1 = vld [vmem:[%s832_s10] ss:$0 sm:$0xff] }
  0x31   :  { %527 = vmatpush3.msra.mxu0 %v281_v5 }
  0xd1   :  { %v125_v11 = vpop.f32.mrf.mxu0 }
  0xd2   :  { %v126_v12 = vadd.f32 %v391_v10, %v125_v11  ;;  %v396_v10 = vld [vmem:[%s829_s7] ss:$0 sm:$0xff] }
  0xd3   :  { %v460_v13 = vpop.f32.mrf.mxu0 }
  0xd4   :  { %131 = vadd.xlane.f32.xlu0 %v126_v12 }
 0x15d   :  { %v132_v16 = vpop.xlane.xlu0 %131 }
 0x15e   :  { %v134_v17 = vmul.f32 0.0078125, %v132_v16 }
 0x160   :  { %v135_v18 = vsub.f32 %v126_v12, %v134_v17  ;;  %v397_v12 = vld [vmem:[%s830_s8] ss:$0 sm:$0xff] }
 0x162   :  { %v136_v19 = vmul.f32 %v135_v18, %v135_v18 }
 0x164   :  { %137 = vadd.xlane.f32.xlu0 %v136_v19 }
 0x1ed   :  { %v138_v34 = vpop.xlane.xlu0 %137 }
 0x1ee   :  { %v139_v35 = vmul.f32 0.0078125, %v138_v34 }
 0x1f0   :  { %v140_v36 = vadd.f32 1e-05, %v139_v35 }
 0x1f2   :  { %536 = vrsqrt.f32 %v140_v36 }
 0x1ff   :  { %v537_v37 = vpop.eup %536 }
 0x200   :  { %v142_v39 = vmul.f32 %v537_v37, %v135_v18 }
 0x202   :  { %v149_v41 = vmul.f32 %v393_v38, %v142_v39 }
 0x204   :  { %v156_v42 = vadd.f32 %v394_v40, %v149_v41 }
 0x206   :  { %v157_v43 = vmul.f32 0.01, %v156_v42 }
 0x208   :  { %v158_v44 = vmax.f32 %v156_v42, %v157_v43 }
 0x20a   :  { %494 = vmatmul.mubr.f32.vlgmr.msra.gmra.mxu1 %v158_v44 }
 0x2ca   :  { %v248_v46 = vpop.f32.mrf.mxu1 }
 0x2cb   :  { %v249_v47 = vadd.f32 %v395_v45, %v248_v46 }
 0x2cc   :  { %v495_v48 = vpop.f32.mrf.mxu1 }
 0x2cd   :  { %254 = vadd.xlane.f32.xlu1 %v249_v47 }
 0x356   :  { %v255_v51 = vpop.xlane.xlu1 %254 }
 0x357   :  { %v256_v52 = vmul.f32 0.0078125, %v255_v51 }
 0x359   :  { %v257_v53 = vsub.f32 %v249_v47, %v256_v52 }
 0x35b   :  { %v258_v54 = vmul.f32 %v257_v53, %v257_v53 }
 0x35d   :  { %259 = vadd.xlane.f32.xlu1 %v258_v54 }
 0x3e6   :  { %v260_v6 = vpop.xlane.xlu1 %259 }
 0x3e7   :  { %v261_v7 = vmul.f32 0.0078125, %v260_v6 }
 0x3e9   :  { %v262_v8 = vadd.f32 1e-05, %v261_v7 }
 0x3eb   :  { %538 = vrsqrt.f32 %v262_v8 }
 0x3f8   :  { %v539_v9 = vpop.eup %538 }
 0x3f9   :  { %v264_v11 = vmul.f32 %v539_v9, %v257_v53 }
 0x3fb   :  { %v271_v13 = vmul.f32 %v396_v10, %v264_v11 }
 0x3fd   :  { %v278_v14 = vadd.f32 %v397_v12, %v271_v13 }
 0x3ff   :  { %v279_v15 = vmul.f32 0.01, %v278_v14 }
 0x401   :  { %v280_v16 = vmax.f32 %v278_v14, %v279_v15 }
 0x403   :  { %529 = vmatmul.mubr.f32.vlgmr.msra.gmra.mxu0 %v280_v16 }
 0x4c3   :  { %v370_v17 = vpop.f32.mrf.mxu0 }
 0x4c4   :  { %v371_v18 = vadd.f32 %v398_v1, %v370_v17 }
 0x4c5   :  { %v530_v19 = vpop.f32.mrf.mxu0 }
 0x4c6   :  { %374 = vst.msk [vmem:[#allocation2] sm:$0xff] %vm55_vm1, %v371_v18 }
 0x4c7   :  { %379 = vsyncadd [#allocation3], 64  ;;  %s564_s7 = smov [#allocation2]  }
 0x4c8   :  { %s380_s1 = sshll.u32 %s564_s7, 4  ;;  %s381_s1 = int_to_ptr.vmem [resolvable:$true] %s380_s1 }
 0x4c9   :  { %s540_s18 = scalar_lea.vmem %s381_s1, 64  ;;  %s544_s8 = scalar_lea.vmem %s381_s1, 128 }
 0x4ca   :  { %p541_p0 = scmp.ne.s32.totalorder %s381_s1, %s540_s18  ;;  %p545_p1 = scmp.lt.s32.totalorder %s381_s1, %s381_s1 }
 0x4cb   :  { %p546_p2 = scmp.lt.s32.totalorder %s544_s8, %s540_s18 }
 0x4cd   :  { %p547_p3 = por %p546_p2, %p545_p1 }
 0x4cf   :  { %p548_p4 = pnand %p547_p3, %p541_p0 }
 0x4d1   :  { %551 = shalt.err (!%p548_p4)
}
 0x4d2   :  { %s565_s19 = smov 64   ;;  %s566_s2 = smov 4  }
 0x4d3   :  { %386 = dma.vmem_to_hbm [thread:$0]  %s381_s1, 64, %s833_s11, [#allocation3], %s565_s19, %s565_s19, %s566_s2  }
 0x4d4   :  { %560 = dma.done.wait [#allocation3], 128  }
 0x4d5   :  { %561 = vsyncadd [#allocation3], 4294967168 }
 0x4d6   :  { %390 = vsyncpa [#allocation3], 1 }

// kernel: tpu_custom_call.1
= control target key start
LH: loop header
LB: loop body
LE: loop exit
PB: predicated region body
PF: predicated region fallthrough
CT: control target
= control target key end

     0   :  { %16 = vsyncpa [#allocation3], 0  ;;  %v562_v1 = vmov 0.0   ;;  %vm563_vm0 = vmmov 0   ;;  %vm55_vm1 = vcmask 523264   ;;  %s822_s0 = inlined_call_operand.vmem [shape: f32[4,64], index: 0, kind: input, shape index: {}]   ;;  %s823_s1 = inlined_call_operand.vmem [shape: f32[64,128], index: 1, kind: input, shape index: {}]   ;;  %s824_s2 = inlined_call_operand.vmem [shape: f32[1,128], index: 2, kind: input, shape index: {}]   ;;  %s825_s3 = inlined_call_operand.vmem [shape: f32[1,128], index: 3, kind: input, shape index: {}]   ;;  %s826_s4 = inlined_call_operand.vmem [shape: f32[1,128], index: 4, kind: input, shape index: {}]   ;;  %s827_s5 = inlined_call_operand.vmem [shape: f32[128,128], index: 5, kind: input, shape index: {}]   ;;  %s828_s6 = inlined_call_operand.vmem [shape: f32[1,128], index: 6, kind: input, shape index: {}]   ;;  %s829_s7 = inlined_call_operand.vmem [shape: f32[1,128], index: 7, kind: input, shape index: {}]   ;;  %s830_s8 = inlined_call_operand.vmem [shape: f32[1,128], index: 8, kind: input, shape index: {}]   ;;  %s831_s9 = inlined_call_operand.vmem [shape: f32[128,64], index: 9, kind: input, shape index: {}]   ;;  %s832_s10 = inlined_call_operand.vmem [shape: f32[1,64], index: 10, kind: input, shape index: {}]   ;;  %s833_s11 = inlined_call_operand.hbm [shape: f32[4,64], index: 11, kind: output, shape index: {}]  }
   0x1   :  { %v47_v0 = vld [vmem:[%s823_s1 + $0x38] sm:$0xff]  ;;  %442 = vmatprep.subr.mxu0 %v562_v1  ;;  %v46_v2 = vld [vmem:[%s823_s1 + $0x30] sm:$0xff]  ;;  %458 = vmatprep.mubr.msk.f32.mxu0 %vm563_vm0, %v562_v1  ;;  %v45_v3 = vld [vmem:[%s823_s1 + $0x28] sm:$0xff] }
   0x2   :  { %443 = vmatpush3.msra.mxu0 %v47_v0  ;;  %461 = vmatprep.subr.mxu1 %v562_v1  ;;  %v44_v4 = vld [vmem:[%s823_s1 + $0x20] sm:$0xff]  ;;  %v43_v5 = vld [vmem:[%s823_s1 + $0x18] sm:$0xff]  ;;  %v42_v6 = vld [vmem:[%s823_s1 + $0x10] sm:$0xff] }
   0x3   :  { %444 = vmatprep.subr.mxu0 %v562_v1  ;;  %493 = vmatprep.mubr.msk.f32.mxu1 %vm563_vm0, %v562_v1  ;;  %v41_v7 = vld [vmem:[%s823_s1 + $0x8] sm:$0xff]  ;;  %v40_v8 = vld [vmem:[%s823_s1] sm:$0xff]  ;;  %v174_v14 = vld [vmem:[%s827_s5 + $0x78] sm:$0xff] }
   0x4   :  { %445 = vmatpush3.msra.mxu0 %v46_v2  ;;  %v39_v9 = vld [vmem:[%s822_s0] sm:$0xff]  ;;  %v173_v15 = vld [vmem:[%s827_s5 + $0x70] sm:$0xff]  ;;  %462 = vmatpush3.msra.mxu1 %v174_v14  ;;  %v172_v20 = vld [vmem:[%s827_s5 + $0x68] sm:$0xff] }
   0x5   :  { %446 = vmatprep.subr.mxu0 %v562_v1  ;;  %v391_v10 = vld [vmem:[%s824_s2] ss:$0 sm:$0xff]  ;;  %463 = vmatprep.subr.mxu1 %v562_v1  ;;  %v170_v22 = vld [vmem:[%s827_s5 + $0x58] sm:$0xff]  ;;  %v169_v23 = vld [vmem:[%s827_s5 + $0x50] sm:$0xff] }
   0x6   :  { %447 = vmatpush3.msra.mxu0 %v45_v3  ;;  %464 = vmatpush3.msra.mxu1 %v173_v15  ;;  %v171_v21 = vld [vmem:[%s827_s5 + $0x60] sm:$0xff]  ;;  %v168_v24 = vld [vmem:[%s827_s5 + $0x48] sm:$0xff]  ;;  %v166_v26 = vld [vmem:[%s827_s5 + $0x38] sm:$0xff] }
   0x7   :  { %448 = vmatprep.subr.mxu0 %v562_v1  ;;  %465 = vmatprep.subr.mxu1 %v562_v1  ;;  %v167_v25 = vld [vmem:[%s827_s5 + $0x40] sm:$0xff]  ;;  %v165_v27 = vld [vmem:[%s827_s5 + $0x30] sm:$0xff]  ;;  %v164_v28 = vld [vmem:[%s827_s5 + $0x28] sm:$0xff] }
   0x8   :  { %449 = vmatpush3.msra.mxu0 %v44_v4  ;;  %466 = vmatpush3.msra.mxu1 %v172_v20  ;;  %v163_v29 = vld [vmem:[%s827_s5 + $0x20] sm:$0xff]  ;;  %v162_v30 = vld [vmem:[%s827_s5 + $0x18] sm:$0xff]  ;;  %v161_v31 = vld [vmem:[%s827_s5 + $0x10] sm:$0xff] }
   0x9   :  { %450 = vmatprep.subr.mxu0 %v562_v1  ;;  %467 = vmatprep.subr.mxu1 %v562_v1  ;;  %v160_v32 = vld [vmem:[%s827_s5 + $0x8] sm:$0xff]  ;;  %v159_v33 = vld [vmem:[%s827_s5] sm:$0xff]  ;;  %v296_v49 = vld [vmem:[%s831_s9 + $0x78] sm:$0xff] }
   0xa   :  { %451 = vmatpush3.msra.mxu0 %v43_v5  ;;  %468 = vmatpush3.msra.mxu1 %v171_v21  ;;  %v393_v38 = vld [vmem:[%s825_s3] ss:$0 sm:$0xff]  ;;  %v295_v50 = vld [vmem:[%s831_s9 + $0x70] sm:$0xff]  ;;  %v294_v55 = vld [vmem:[%s831_s9 + $0x68] sm:$0xff] }
   0xb   :  { %452 = vmatprep.subr.mxu0 %v562_v1  ;;  %469 = vmatprep.subr.mxu1 %v562_v1  ;;  %v394_v40 = vld [vmem:[%s826_s4] ss:$0 sm:$0xff]  ;;  %v292_v57 = vld [vmem:[%s831_s9 + $0x58] sm:$0xff]  ;;  %v291_v58 = vld [vmem:[%s831_s9 + $0x50] sm:$0xff] }
   0xc   :  { %453 = vmatpush3.msra.mxu0 %v42_v6  ;;  %470 = vmatpush3.msra.mxu1 %v170_v22  ;;  %v395_v45 = vld [vmem:[%s828_s6] ss:$0 sm:$0xff]  ;;  %v290_v59 = vld [vmem:[%s831_s9 + $0x48] sm:$0xff]  ;;  %v288_v61 = vld [vmem:[%s831_s9 + $0x38] sm:$0xff] }
   0xd   :  { %454 = vmatprep.subr.mxu0 %v562_v1  ;;  %471 = vmatprep.subr.mxu1 %v562_v1  ;;  %v293_v56 = vld [vmem:[%s831_s9 + $0x60] sm:$0xff]  ;;  %v287_v62 = vld [vmem:[%s831_s9 + $0x30] sm:$0xff]  ;;  %v286_v63 = vld [vmem:[%s831_s9 + $0x28] sm:$0xff] }
   0xe   :  { %455 = vmatpush3.msra.mxu0 %v41_v7  ;;  %472 = vmatpush3.msra.mxu1 %v169_v23  ;;  %v289_v60 = vld [vmem:[%s831_s9 + $0x40] sm:$0xff]  ;;  %v284_v2 = vld [vmem:[%s831_s9 + $0x18] sm:$0xff]  ;;  %v283_v3 = vld [vmem:[%s831_s9 + $0x10] sm:$0xff] }
   0xf   :  { %456 = vmatprep.subr.mxu0 %v562_v1  ;;  %473 = vmatprep.subr.mxu1 %v562_v1  ;;  %v285_v0 = vld [vmem:[%s831_s9 + $0x20] sm:$0xff]  ;;  %v282_v4 = vld [vmem:[%s831_s9 + $0x8] sm:$0xff] }
  0x10   :  { %457 = vmatpush3.msra.mxu0 %v40_v8  ;;  %474 = vmatpush3.msra.mxu1 %v168_v24  ;;  %v281_v5 = vld [vmem:[%s831_s9] sm:$0xff] }
  0x11   :  { %459 = vmatmul.mubr.msk.f32.vlgmr.msra.gmra.mxu0 %vm55_vm1, %v39_v9  ;;  %496 = vmatprep.subr.mxu0 %v562_v1 }
  0x12   :  { %528 = vmatprep.mubr.msk.f32.mxu0 %vm563_vm0, %v562_v1  ;;  %475 = vmatprep.subr.mxu1 %v562_v1 }
  0x13   :  { %476 = vmatpush3.msra.mxu1 %v167_v25  ;;  %497 = vmatpush3.msra.mxu0 %v296_v49 }
  0x14   :  { %477 = vmatprep.subr.mxu1 %v562_v1  ;;  %498 = vmatprep.subr.mxu0 %v562_v1 }
  0x15   :  { %478 = vmatpush3.msra.mxu1 %v166_v26  ;;  %499 = vmatpush3.msra.mxu0 %v295_v50 }
  0x16   :  { %479 = vmatprep.subr.mxu1 %v562_v1  ;;  %500 = vmatprep.subr.mxu0 %v562_v1 }
  0x17   :  { %480 = vmatpush3.msra.mxu1 %v165_v27  ;;  %501 = vmatpush3.msra.mxu0 %v294_v55 }
  0x18   :  { %481 = vmatprep.subr.mxu1 %v562_v1  ;;  %502 = vmatprep.subr.mxu0 %v562_v1 }
  0x19   :  { %482 = vmatpush3.msra.mxu1 %v164_v28  ;;  %503 = vmatpush3.msra.mxu0 %v293_v56 }
  0x1a   :  { %483 = vmatprep.subr.mxu1 %v562_v1  ;;  %504 = vmatprep.subr.mxu0 %v562_v1 }
  0x1b   :  { %484 = vmatpush3.msra.mxu1 %v163_v29  ;;  %505 = vmatpush3.msra.mxu0 %v292_v57 }
  0x1c   :  { %485 = vmatprep.subr.mxu1 %v562_v1  ;;  %506 = vmatprep.subr.mxu0 %v562_v1 }
  0x1d   :  { %486 = vmatpush3.msra.mxu1 %v162_v30  ;;  %507 = vmatpush3.msra.mxu0 %v291_v58 }
  0x1e   :  { %487 = vmatprep.subr.mxu1 %v562_v1  ;;  %508 = vmatprep.subr.mxu0 %v562_v1 }
  0x1f   :  { %488 = vmatpush3.msra.mxu1 %v161_v31  ;;  %509 = vmatpush3.msra.mxu0 %v290_v59 }
  0x20   :  { %489 = vmatprep.subr.mxu1 %v562_v1  ;;  %510 = vmatprep.subr.mxu0 %v562_v1 }
  0x21   :  { %490 = vmatpush3.msra.mxu1 %v160_v32  ;;  %511 = vmatpush3.msra.mxu0 %v289_v60 }
  0x22   :  { %491 = vmatprep.subr.mxu1 %v562_v1  ;;  %512 = vmatprep.subr.mxu0 %v562_v1 }
  0x23   :  { %492 = vmatpush3.msra.mxu1 %v159_v33  ;;  %513 = vmatpush3.msra.mxu0 %v288_v61 }
  0x24   :  { %514 = vmatprep.subr.mxu0 %v562_v1 }
  0x25   :  { %515 = vmatpush3.msra.mxu0 %v287_v62 }
  0x26   :  { %516 = vmatprep.subr.mxu0 %v562_v1 }
  0x27   :  { %517 = vmatpush3.msra.mxu0 %v286_v63 }
  0x28   :  { %518 = vmatprep.subr.mxu0 %v562_v1 }
  0x29   :  { %519 = vmatpush3.msra.mxu0 %v285_v0 }
  0x2a   :  { %520 = vmatprep.subr.mxu0 %v562_v1 }
  0x2b   :  { %521 = vmatpush3.msra.mxu0 %v284_v2 }
  0x2c   :  { %522 = vmatprep.subr.mxu0 %v562_v1 }
  0x2d   :  { %523 = vmatpush3.msra.mxu0 %v283_v3 }
  0x2e   :  { %524 = vmatprep.subr.mxu0 %v562_v1 }
  0x2f   :  { %525 = vmatpush3.msra.mxu0 %v282_v4 }
  0x30   :  { %526 = vmatprep.subr.mxu0 %v562_v1  ;;  %v398_v1 = vld [vmem:[%s832_s10] ss:$0 sm:$0xff] }
  0x31   :  { %527 = vmatpush3.msra.mxu0 %v281_v5 }
  0xd1   :  { %v125_v11 = vpop.f32.mrf.mxu0 }
  0xd2   :  { %v126_v12 = vadd.f32 %v391_v10, %v125_v11  ;;  %v396_v10 = vld [vmem:[%s829_s7] ss:$0 sm:$0xff] }
  0xd3   :  { %v460_v13 = vpop.f32.mrf.mxu0 }
  0xd4   :  { %131 = vadd.xlane.f32.xlu0 %v126_v12 }
 0x15d   :  { %v132_v16 = vpop.xlane.xlu0 %131 }
 0x15e   :  { %v134_v17 = vmul.f32 0.0078125, %v132_v16 }
 0x160   :  { %v135_v18 = vsub.f32 %v126_v12, %v134_v17  ;;  %v397_v12 = vld [vmem:[%s830_s8] ss:$0 sm:$0xff] }
 0x162   :  { %v136_v19 = vmul.f32 %v135_v18, %v135_v18 }
 0x164   :  { %137 = vadd.xlane.f32.xlu0 %v136_v19 }
 0x1ed   :  { %v138_v34 = vpop.xlane.xlu0 %137 }
 0x1ee   :  { %v139_v35 = vmul.f32 0.0078125, %v138_v34 }
 0x1f0   :  { %v140_v36 = vadd.f32 1e-05, %v139_v35 }
 0x1f2   :  { %536 = vrsqrt.f32 %v140_v36 }
 0x1ff   :  { %v537_v37 = vpop.eup %536 }
 0x200   :  { %v142_v39 = vmul.f32 %v537_v37, %v135_v18 }
 0x202   :  { %v149_v41 = vmul.f32 %v393_v38, %v142_v39 }
 0x204   :  { %v156_v42 = vadd.f32 %v394_v40, %v149_v41 }
 0x206   :  { %v157_v43 = vmul.f32 0.01, %v156_v42 }
 0x208   :  { %v158_v44 = vmax.f32 %v156_v42, %v157_v43 }
 0x20a   :  { %494 = vmatmul.mubr.f32.vlgmr.msra.gmra.mxu1 %v158_v44 }
 0x2ca   :  { %v248_v46 = vpop.f32.mrf.mxu1 }
 0x2cb   :  { %v249_v47 = vadd.f32 %v395_v45, %v248_v46 }
 0x2cc   :  { %v495_v48 = vpop.f32.mrf.mxu1 }
 0x2cd   :  { %254 = vadd.xlane.f32.xlu1 %v249_v47 }
 0x356   :  { %v255_v51 = vpop.xlane.xlu1 %254 }
 0x357   :  { %v256_v52 = vmul.f32 0.0078125, %v255_v51 }
 0x359   :  { %v257_v53 = vsub.f32 %v249_v47, %v256_v52 }
 0x35b   :  { %v258_v54 = vmul.f32 %v257_v53, %v257_v53 }
 0x35d   :  { %259 = vadd.xlane.f32.xlu1 %v258_v54 }
 0x3e6   :  { %v260_v6 = vpop.xlane.xlu1 %259 }
 0x3e7   :  { %v261_v7 = vmul.f32 0.0078125, %v260_v6 }
 0x3e9   :  { %v262_v8 = vadd.f32 1e-05, %v261_v7 }
 0x3eb   :  { %538 = vrsqrt.f32 %v262_v8 }
 0x3f8   :  { %v539_v9 = vpop.eup %538 }
 0x3f9   :  { %v264_v11 = vmul.f32 %v539_v9, %v257_v53 }
 0x3fb   :  { %v271_v13 = vmul.f32 %v396_v10, %v264_v11 }
 0x3fd   :  { %v278_v14 = vadd.f32 %v397_v12, %v271_v13 }
 0x3ff   :  { %v279_v15 = vmul.f32 0.01, %v278_v14 }
 0x401   :  { %v280_v16 = vmax.f32 %v278_v14, %v279_v15 }
 0x403   :  { %529 = vmatmul.mubr.f32.vlgmr.msra.gmra.mxu0 %v280_v16 }
 0x4c3   :  { %v370_v17 = vpop.f32.mrf.mxu0 }
 0x4c4   :  { %v371_v18 = vadd.f32 %v398_v1, %v370_v17 }
 0x4c5   :  { %v530_v19 = vpop.f32.mrf.mxu0 }
 0x4c6   :  { %374 = vst.msk [vmem:[#allocation2] sm:$0xff] %vm55_vm1, %v371_v18 }
 0x4c7   :  { %379 = vsyncadd [#allocation3], 64  ;;  %s564_s7 = smov [#allocation2]  }
 0x4c8   :  { %s380_s1 = sshll.u32 %s564_s7, 4  ;;  %s381_s1 = int_to_ptr.vmem [resolvable:$true] %s380_s1 }
 0x4c9   :  { %s540_s18 = scalar_lea.vmem %s381_s1, 64  ;;  %s544_s8 = scalar_lea.vmem %s381_s1, 128 }
 0x4ca   :  { %p541_p0 = scmp.ne.s32.totalorder %s381_s1, %s540_s18  ;;  %p545_p1 = scmp.lt.s32.totalorder %s381_s1, %s381_s1 }
 0x4cb   :  { %p546_p2 = scmp.lt.s32.totalorder %s544_s8, %s540_s18 }
 0x4cd   :  { %p547_p3 = por %p546_p2, %p545_p1 }
 0x4cf   :  { %p548_p4 = pnand %p547_p3, %p541_p0 }
 0x4d1   :  { %551 = shalt.err (!%p548_p4)
}
 0x4d2   :  { %s565_s19 = smov 64   ;;  %s566_s2 = smov 4  }
 0x4d3   :  { %386 = dma.vmem_to_hbm [thread:$0]  %s381_s1, 64, %s833_s11, [#allocation3], %s565_s19, %s565_s19, %s566_s2  }
 0x4d4   :  { %560 = dma.done.wait [#allocation3], 128  }
 0x4d5   :  { %561 = vsyncadd [#allocation3], 4294967168 }
 0x4d6   :  { %390 = vsyncpa [#allocation3], 1 }

</bundles_post_ra>
